<compile_context>
chip_gen: v7x
topology: tpu7x:2x2x1
jax: 0.10.0
libtpu: 0.0.40
codegen_flags: <defaults>
</compile_context>

<pallas_src>
import functools

import jax
import jax.numpy as jnp
from jax.experimental import pallas as pl
from jax.experimental.pallas import tpu as pltpu


def lstm_kernel(x_ref, wih_ref, whh_ref, b_ref, wout_ref, bout_ref,
                out_ref, gx_ref, *, mxu_dtype):
    """One batch tile of the whole-sequence LSTM forward.

    x_ref    : (T, TB, N)   time-major input tile (VMEM)
    wih_ref  : (N, 4H)      input->gates weight
    whh_ref  : (H, 4H)      hidden->gates weight
    b_ref    : (1, 4H)      combined gate bias (b_ih + b_hh)
    wout_ref : (1, H)       output Linear weight (row vector)
    bout_ref : (1, 1)       output Linear bias (SMEM scalar)
    out_ref  : (TB, 1)      prediction for this batch tile
    gx_ref   : (T, TB, 4H)  VMEM scratch for the hoisted input projection
    """
    T, TB, N = x_ref.shape
    H = whh_ref.shape[0]

    # ---- Phase 1: hoisted input projection --------------------------------
    # One MXU matmul over all T*TB rows; TB is a multiple of 8 so the reshapes
    # below are tile-aligned no-ops.  Result is staged T-major so the
    # recurrence reads gx_ref[t] as a contiguous leading-axis ref slice.
    x_flat = x_ref[...].reshape(T * TB, N).astype(mxu_dtype)
    gx = jnp.dot(x_flat, wih_ref[...].astype(mxu_dtype),
                 preferred_element_type=jnp.float32) + b_ref[...]     # (T*TB, 4H)
    gx_ref[...] = gx.reshape(T, TB, 4 * H)

    w_hh = whh_ref[...].astype(mxu_dtype)

    # ---- Phase 2: recurrence (fully unrolled; T is tiny & static) ---------
    # If T or 4H grow, switch to lax.fori_loop(unroll=2-4) to bound vreg
    # pressure.  (Holding W_hh in the MXU staging registers via
    # pltpu.matmul_push_rhs / matmul_acc_lhs would also shave the per-step RHS
    # push; kept as jnp.dot here for robustness at these tiny shapes.)
    h = jnp.zeros((TB, H), jnp.float32)
    c = jnp.zeros((TB, H), jnp.float32)
    for t in range(T):
        gates = gx_ref[t] + jnp.dot(h.astype(mxu_dtype), w_hh,
                                    preferred_element_type=jnp.float32)  # (TB, 4H)
        # One full-tile sigmoid covers i/f/o; tanh only on the g-gate slice
        # (the EUP is on the serial chain -> don't process 4x the lanes).
        sig = jax.nn.sigmoid(gates)
        i_g = sig[:, 0 * H:1 * H]
        f_g = sig[:, 1 * H:2 * H]
        o_g = sig[:, 3 * H:4 * H]
        g_g = jnp.tanh(gates[:, 2 * H:3 * H])
        c = f_g * c + i_g * g_g
        h = o_g * jnp.tanh(c)

    # ---- Output head: Linear(H -> 1) on the final hidden state ------------
    # VPU multiply + lane reduce; no MXU fill/drain for a single-lane result.
    y = jnp.sum(h * wout_ref[...], axis=-1, keepdims=True) + bout_ref[0, 0]
    out_ref[...] = y.astype(out_ref.dtype)


def shallow_regression_lstm(x, w_ih, w_hh, b, w_out, b_out, *,
                            mxu_dtype=jnp.float32):
    """x: (batch, seq, num_sensors) float32 (batch-first, like PyTorch).
    Returns (batch,) float32 == ShallowRegressionLSTM.forward(x).

    mxu_dtype=jnp.bfloat16 casts only the matmul operands (f32 accumulation,
    f32 elementwise math); recommended on v6e/v7x when ~1e-3 abs error is
    acceptable."""
    B, T, N = x.shape
    H = w_hh.shape[0]
    assert w_ih.shape == (N, 4 * H)
    assert w_hh.shape == (H, 4 * H)
    assert b.shape == (1, 4 * H)
    assert w_out.shape == (H, 1)
    assert b_out.shape == (1, 1)

    # Pad the batch up to a multiple of 8 rows (f32 sublane tile); padded rows
    # are zero and dropped after the kernel.  Large batches get 128-row tiles
    # over a parallel grid.
    B_pad = -(-B // 8) * 8
    if B_pad >= 128:
        TB = 128
        B_pad = -(-B_pad // TB) * TB
    else:
        TB = B_pad
    nb = B_pad // TB

    # Time-major, batch-padded input: (T, B_pad, N).  Transpose/pad happen
    # once in the wrapper on a tiny array; in-kernel reshapes are then
    # tile-aligned no-ops.
    x_p = jnp.zeros((B_pad, T, N), x.dtype).at[:B].set(x)
    x_tbn = jnp.transpose(x_p, (1, 0, 2))
    w_out_row = w_out.reshape(1, H)

    out = pl.pallas_call(
        functools.partial(lstm_kernel, mxu_dtype=mxu_dtype),
        out_shape=jax.ShapeDtypeStruct((B_pad, 1), jnp.float32),
        grid_spec=pltpu.PrefetchScalarGridSpec(
            num_scalar_prefetch=0,
            # Batch grid: each tile runs an independent LSTM.  "parallel"
            # lets Mosaic shard tiles across both TensorCores on v7x and
            # restores double-buffering of the x DMA when B is large.
            grid=(nb,),
            in_specs=[
                pl.BlockSpec((T, TB, N), lambda i: (0, i, 0)),      # x (T-major)
                pl.BlockSpec((N, 4 * H), lambda i: (0, 0)),         # W_ih
                pl.BlockSpec((H, 4 * H), lambda i: (0, 0)),         # W_hh
                pl.BlockSpec((1, 4 * H), lambda i: (0, 0)),         # gate bias
                pl.BlockSpec((1, H), lambda i: (0, 0)),             # W_out row
                pl.BlockSpec(memory_space=pltpu.MemorySpace.SMEM),  # b_out scalar
            ],
            out_specs=pl.BlockSpec((TB, 1), lambda i: (i, 0)),
            scratch_shapes=[pltpu.VMEM((T, TB, 4 * H), jnp.float32)],
        ),
        compiler_params=pltpu.CompilerParams(
            dimension_semantics=("parallel",),
            # Per-block footprint is ~50 KiB at these shapes; 32 MiB stays
            # inside every generation's scoped VMEM (incl. v7x's 64 MiB
            # physical).  If H/T/B scale so the resident gx block
            # (16*TB*T*H bytes) approaches this, chunk T instead.
            vmem_limit_bytes=32 * 1024 * 1024),
    )(x_tbn, w_ih, w_hh, b, w_out_row, b_out)

    return out[:B, 0]


def reference_forward(x, w_ih, w_hh, b, w_out, b_out):
    """Pure-JAX reference matching PyTorch nn.LSTM + Linear semantics."""
    B, T, N = x.shape
    H = w_hh.shape[0]
    h = jnp.zeros((B, H), jnp.float32)
    c = jnp.zeros((B, H), jnp.float32)
    for t in range(T):
        gates = x[:, t, :] @ w_ih + h @ w_hh + b
        i_g = jax.nn.sigmoid(gates[:, 0 * H:1 * H])
        f_g = jax.nn.sigmoid(gates[:, 1 * H:2 * H])
        g_g = jnp.tanh(gates[:, 2 * H:3 * H])
        o_g = jax.nn.sigmoid(gates[:, 3 * H:4 * H])
        c = f_g * c + i_g * g_g
        h = o_g * jnp.tanh(c)
    return (h @ w_out + b_out).reshape(-1)


if __name__ == "__main__":
    # Small shapes consistent with the module's forward:
    batch, seq, num_sensors, hidden = 2, 8, 4, 32

    key = jax.random.PRNGKey(0)
    ks = jax.random.split(key, 6)
    bound = 1.0 / (hidden ** 0.5)  # PyTorch LSTM/Linear default uniform bound

    # Deterministic synthetic parameters (stored transposed vs. PyTorch).
    w_ih = jax.random.uniform(ks[0], (num_sensors, 4 * hidden),
                              jnp.float32, -bound, bound)
    w_hh = jax.random.uniform(ks[1], (hidden, 4 * hidden),
                              jnp.float32, -bound, bound)
    # combined bias = b_ih + b_hh (PyTorch has both; the sum is equivalent)
    b = jax.random.uniform(ks[2], (1, 4 * hidden), jnp.float32, -bound, bound)
    w_out = jax.random.uniform(ks[3], (hidden, 1), jnp.float32, -bound, bound)
    b_out = jax.random.uniform(ks[4], (1, 1), jnp.float32, -bound, bound)

    x = jax.random.normal(ks[5], (batch, seq, num_sensors), jnp.float32)

    ref = reference_forward(x, w_ih, w_hh, b, w_out, b_out)

    # Default f32 MXU path — matches the f32 PyTorch reference tightly.
    out_f32 = jax.block_until_ready(
        shallow_regression_lstm(x, w_ih, w_hh, b, w_out, b_out))
    assert out_f32.shape == (batch,)
    assert jnp.allclose(out_f32, ref, atol=1e-5, rtol=1e-5), (out_f32, ref)

    # bf16-operand MXU path (v6e/v7x recommendation) — f32 accumulate and
    # elementwise math; looser tolerance per the bf16 mantissa.
    out_bf16 = jax.block_until_ready(
        shallow_regression_lstm(x, w_ih, w_hh, b, w_out, b_out,
                                mxu_dtype=jnp.bfloat16))
    assert jnp.allclose(out_bf16, ref, atol=2e-2, rtol=2e-2), (out_bf16, ref)

    print("KERNEL_OK")
</pallas_src>

<mosaic_0001>
module attributes {stable_mosaic.version = 11 : i64} {
  func.func @lstm_kernel(%arg0: i32, %arg1: memref<8x8x4xf32, #tpu.memory_space<vmem>>, %arg2: memref<4x128xf32, #tpu.memory_space<vmem>>, %arg3: memref<32x128xf32, #tpu.memory_space<vmem>>, %arg4: memref<1x128xf32, #tpu.memory_space<vmem>>, %arg5: memref<1x32xf32, #tpu.memory_space<vmem>>, %arg6: memref<1x1xf32, #tpu.memory_space<smem>>, %arg7: memref<8x1xf32, #tpu.memory_space<vmem>>, %arg8: memref<8x8x128xf32, #tpu.memory_space<vmem>>) attributes {dimension_semantics = [#tpu.dimension_semantics<parallel>], iteration_bounds = array<i64: 1>, scalar_prefetch = 0 : i64, scratch_operands = 1 : i64, tpu.core_type = #tpu.core_type<tc>, window_params = [{transform_indices = @transform_0, window_bounds = array<i64: 8, 8, 4>}, {pipeline_mode = #tpu.pipeline_mode<synchronous>, transform_indices = @transform_1, window_bounds = array<i64: 4, 128>}, {pipeline_mode = #tpu.pipeline_mode<synchronous>, transform_indices = @transform_2, window_bounds = array<i64: 32, 128>}, {pipeline_mode = #tpu.pipeline_mode<synchronous>, transform_indices = @transform_3, window_bounds = array<i64: 1, 128>}, {pipeline_mode = #tpu.pipeline_mode<synchronous>, transform_indices = @transform_4, window_bounds = array<i64: 1, 32>}, {transform_indices = @transform_5, window_bounds = array<i64: 1, 1>}, {transform_indices = @transform_6, window_bounds = array<i64: 8, 1>}]} {
    %c0 = arith.constant 0 : index
    %c0_0 = arith.constant 0 : index
    %c0_1 = arith.constant 0 : index
    %0 = vector.load %arg1[%c0, %c0_0, %c0_1] : memref<8x8x4xf32, #tpu.memory_space<vmem>>, vector<8x8x4xf32>
    %1 = vector.shape_cast %0 : vector<8x8x4xf32> to vector<64x4xf32>
    %c0_2 = arith.constant 0 : index
    %c0_3 = arith.constant 0 : index
    %2 = vector.load %arg2[%c0_2, %c0_3] : memref<4x128xf32, #tpu.memory_space<vmem>>, vector<4x128xf32>
    %cst = arith.constant dense<0.000000e+00> : vector<64x128xf32>
    %3 = tpu.matmul %1, %2, %cst {dimension_numbers = #tpu.dot_dimension_numbers<[1], [0], [0], [1], [0, 0, 1, 1], [], []>} : vector<64x4xf32>, vector<4x128xf32>, vector<64x128xf32> -> vector<64x128xf32>
    %c0_4 = arith.constant 0 : index
    %c0_5 = arith.constant 0 : index
    %4 = vector.load %arg4[%c0_4, %c0_5] : memref<1x128xf32, #tpu.memory_space<vmem>>, vector<1x128xf32>
    %5 = vector.broadcast %4 : vector<1x128xf32> to vector<64x128xf32>
    %6 = arith.addf %3, %5 : vector<64x128xf32>
    %7 = vector.shape_cast %6 : vector<64x128xf32> to vector<8x8x128xf32>
    %c0_6 = arith.constant 0 : index
    %c0_7 = arith.constant 0 : index
    %c0_8 = arith.constant 0 : index
    %8 = vector.load %arg8[%c0_6, %c0_7, %c0_8] : memref<8x8x128xf32, #tpu.memory_space<vmem>>, vector<8x8x128xf32>
    tpu.vector_store %arg8[%c0_6, %c0_7, %c0_8], %7 {strides = array<i32>} : memref<8x8x128xf32, #tpu.memory_space<vmem>>, vector<8x8x128xf32>,
    %c0_9 = arith.constant 0 : index
    %c0_10 = arith.constant 0 : index
    %9 = vector.load %arg3[%c0_9, %c0_10] : memref<32x128xf32, #tpu.memory_space<vmem>>, vector<32x128xf32>
    %cst_11 = arith.constant 0.000000e+00 : f32
    %10 = vector.broadcast %cst_11 : f32 to vector<8x32xf32>
    %cst_12 = arith.constant 0.000000e+00 : f32
    %11 = vector.broadcast %cst_12 : f32 to vector<8x32xf32>
    %c0_13 = arith.constant 0 : index
    %c0_14 = arith.constant 0 : index
    %c0_15 = arith.constant 0 : index
    %12 = vector.load %arg8[%c0_13, %c0_14, %c0_15] : memref<8x8x128xf32, #tpu.memory_space<vmem>>, vector<1x8x128xf32>
    %13 = vector.shape_cast %12 : vector<1x8x128xf32> to vector<8x128xf32>
    %cst_16 = arith.constant dense<0.000000e+00> : vector<8x128xf32>
    %14 = tpu.matmul %10, %9, %cst_16 {dimension_numbers = #tpu.dot_dimension_numbers<[1], [0], [0], [1], [0, 0, 1, 1], [], []>} : vector<8x32xf32>, vector<32x128xf32>, vector<8x128xf32> -> vector<8x128xf32>
    %15 = arith.addf %13, %14 : vector<8x128xf32>
    %16 = arith.negf %15 : vector<8x128xf32>
    %17 = math.exp %16 : vector<8x128xf32>
    %cst_17 = arith.constant 1.000000e+00 : f32
    %18 = vector.broadcast %cst_17 : f32 to vector<8x128xf32>
    %19 = arith.addf %18, %17 : vector<8x128xf32>
    %20 = arith.divf %18, %19 : vector<8x128xf32>
    %21 = vector.extract_strided_slice %20 {offsets = [0, 0], sizes = [8, 32], strides = [1, 1]} : vector<8x128xf32> to vector<8x32xf32>
    %22 = vector.extract_strided_slice %20 {offsets = [0, 32], sizes = [8, 32], strides = [1, 1]} : vector<8x128xf32> to vector<8x32xf32>
    %23 = vector.extract_strided_slice %20 {offsets = [0, 96], sizes = [8, 32], strides = [1, 1]} : vector<8x128xf32> to vector<8x32xf32>
    %24 = vector.extract_strided_slice %15 {offsets = [0, 64], sizes = [8, 32], strides = [1, 1]} : vector<8x128xf32> to vector<8x32xf32>
    %25 = math.tanh %24 : vector<8x32xf32>
    %26 = arith.mulf %22, %11 : vector<8x32xf32>
    %27 = arith.mulf %21, %25 : vector<8x32xf32>
    %28 = arith.addf %26, %27 : vector<8x32xf32>
    %29 = math.tanh %28 : vector<8x32xf32>
    %30 = arith.mulf %23, %29 : vector<8x32xf32>
    %c1 = arith.constant 1 : index
    %c0_18 = arith.constant 0 : index
    %c0_19 = arith.constant 0 : index
    %31 = vector.load %arg8[%c1, %c0_18, %c0_19] : memref<8x8x128xf32, #tpu.memory_space<vmem>>, vector<1x8x128xf32>
    %32 = vector.shape_cast %31 : vector<1x8x128xf32> to vector<8x128xf32>
    %cst_20 = arith.constant dense<0.000000e+00> : vector<8x128xf32>
    %33 = tpu.matmul %30, %9, %cst_20 {dimension_numbers = #tpu.dot_dimension_numbers<[1], [0], [0], [1], [0, 0, 1, 1], [], []>} : vector<8x32xf32>, vector<32x128xf32>, vector<8x128xf32> -> vector<8x128xf32>
    %34 = arith.addf %32, %33 : vector<8x128xf32>
    %35 = arith.negf %34 : vector<8x128xf32>
    %36 = math.exp %35 : vector<8x128xf32>
    %cst_21 = arith.constant 1.000000e+00 : f32
    %37 = vector.broadcast %cst_21 : f32 to vector<8x128xf32>
    %38 = arith.addf %37, %36 : vector<8x128xf32>
    %39 = arith.divf %37, %38 : vector<8x128xf32>
    %40 = vector.extract_strided_slice %39 {offsets = [0, 0], sizes = [8, 32], strides = [1, 1]} : vector<8x128xf32> to vector<8x32xf32>
    %41 = vector.extract_strided_slice %39 {offsets = [0, 32], sizes = [8, 32], strides = [1, 1]} : vector<8x128xf32> to vector<8x32xf32>
    %42 = vector.extract_strided_slice %39 {offsets = [0, 96], sizes = [8, 32], strides = [1, 1]} : vector<8x128xf32> to vector<8x32xf32>
    %43 = vector.extract_strided_slice %34 {offsets = [0, 64], sizes = [8, 32], strides = [1, 1]} : vector<8x128xf32> to vector<8x32xf32>
    %44 = math.tanh %43 : vector<8x32xf32>
    %45 = arith.mulf %41, %28 : vector<8x32xf32>
    %46 = arith.mulf %40, %44 : vector<8x32xf32>
    %47 = arith.addf %45, %46 : vector<8x32xf32>
    %48 = math.tanh %47 : vector<8x32xf32>
    %49 = arith.mulf %42, %48 : vector<8x32xf32>
    %c2 = arith.constant 2 : index
    %c0_22 = arith.constant 0 : index
    %c0_23 = arith.constant 0 : index
    %50 = vector.load %arg8[%c2, %c0_22, %c0_23] : memref<8x8x128xf32, #tpu.memory_space<vmem>>, vector<1x8x128xf32>
    %51 = vector.shape_cast %50 : vector<1x8x128xf32> to vector<8x128xf32>
    %cst_24 = arith.constant dense<0.000000e+00> : vector<8x128xf32>
    %52 = tpu.matmul %49, %9, %cst_24 {dimension_numbers = #tpu.dot_dimension_numbers<[1], [0], [0], [1], [0, 0, 1, 1], [], []>} : vector<8x32xf32>, vector<32x128xf32>, vector<8x128xf32> -> vector<8x128xf32>
    %53 = arith.addf %51, %52 : vector<8x128xf32>
    %54 = arith.negf %53 : vector<8x128xf32>
    %55 = math.exp %54 : vector<8x128xf32>
    %cst_25 = arith.constant 1.000000e+00 : f32
    %56 = vector.broadcast %cst_25 : f32 to vector<8x128xf32>
    %57 = arith.addf %56, %55 : vector<8x128xf32>
    %58 = arith.divf %56, %57 : vector<8x128xf32>
    %59 = vector.extract_strided_slice %58 {offsets = [0, 0], sizes = [8, 32], strides = [1, 1]} : vector<8x128xf32> to vector<8x32xf32>
    %60 = vector.extract_strided_slice %58 {offsets = [0, 32], sizes = [8, 32], strides = [1, 1]} : vector<8x128xf32> to vector<8x32xf32>
    %61 = vector.extract_strided_slice %58 {offsets = [0, 96], sizes = [8, 32], strides = [1, 1]} : vector<8x128xf32> to vector<8x32xf32>
    %62 = vector.extract_strided_slice %53 {offsets = [0, 64], sizes = [8, 32], strides = [1, 1]} : vector<8x128xf32> to vector<8x32xf32>
    %63 = math.tanh %62 : vector<8x32xf32>
    %64 = arith.mulf %60, %47 : vector<8x32xf32>
    %65 = arith.mulf %59, %63 : vector<8x32xf32>
    %66 = arith.addf %64, %65 : vector<8x32xf32>
    %67 = math.tanh %66 : vector<8x32xf32>
    %68 = arith.mulf %61, %67 : vector<8x32xf32>
    %c3 = arith.constant 3 : index
    %c0_26 = arith.constant 0 : index
    %c0_27 = arith.constant 0 : index
    %69 = vector.load %arg8[%c3, %c0_26, %c0_27] : memref<8x8x128xf32, #tpu.memory_space<vmem>>, vector<1x8x128xf32>
    %70 = vector.shape_cast %69 : vector<1x8x128xf32> to vector<8x128xf32>
    %cst_28 = arith.constant dense<0.000000e+00> : vector<8x128xf32>
    %71 = tpu.matmul %68, %9, %cst_28 {dimension_numbers = #tpu.dot_dimension_numbers<[1], [0], [0], [1], [0, 0, 1, 1], [], []>} : vector<8x32xf32>, vector<32x128xf32>, vector<8x128xf32> -> vector<8x128xf32>
    %72 = arith.addf %70, %71 : vector<8x128xf32>
    %73 = arith.negf %72 : vector<8x128xf32>
    %74 = math.exp %73 : vector<8x128xf32>
    %cst_29 = arith.constant 1.000000e+00 : f32
    %75 = vector.broadcast %cst_29 : f32 to vector<8x128xf32>
    %76 = arith.addf %75, %74 : vector<8x128xf32>
    %77 = arith.divf %75, %76 : vector<8x128xf32>
    %78 = vector.extract_strided_slice %77 {offsets = [0, 0], sizes = [8, 32], strides = [1, 1]} : vector<8x128xf32> to vector<8x32xf32>
    %79 = vector.extract_strided_slice %77 {offsets = [0, 32], sizes = [8, 32], strides = [1, 1]} : vector<8x128xf32> to vector<8x32xf32>
    %80 = vector.extract_strided_slice %77 {offsets = [0, 96], sizes = [8, 32], strides = [1, 1]} : vector<8x128xf32> to vector<8x32xf32>
    %81 = vector.extract_strided_slice %72 {offsets = [0, 64], sizes = [8, 32], strides = [1, 1]} : vector<8x128xf32> to vector<8x32xf32>
    %82 = math.tanh %81 : vector<8x32xf32>
    %83 = arith.mulf %79, %66 : vector<8x32xf32>
    %84 = arith.mulf %78, %82 : vector<8x32xf32>
    %85 = arith.addf %83, %84 : vector<8x32xf32>
    %86 = math.tanh %85 : vector<8x32xf32>
    %87 = arith.mulf %80, %86 : vector<8x32xf32>
    %c4 = arith.constant 4 : index
    %c0_30 = arith.constant 0 : index
    %c0_31 = arith.constant 0 : index
    %88 = vector.load %arg8[%c4, %c0_30, %c0_31] : memref<8x8x128xf32, #tpu.memory_space<vmem>>, vector<1x8x128xf32>
    %89 = vector.shape_cast %88 : vector<1x8x128xf32> to vector<8x128xf32>
    %cst_32 = arith.constant dense<0.000000e+00> : vector<8x128xf32>
    %90 = tpu.matmul %87, %9, %cst_32 {dimension_numbers = #tpu.dot_dimension_numbers<[1], [0], [0], [1], [0, 0, 1, 1], [], []>} : vector<8x32xf32>, vector<32x128xf32>, vector<8x128xf32> -> vector<8x128xf32>
    %91 = arith.addf %89, %90 : vector<8x128xf32>
    %92 = arith.negf %91 : vector<8x128xf32>
    %93 = math.exp %92 : vector<8x128xf32>
    %cst_33 = arith.constant 1.000000e+00 : f32
    %94 = vector.broadcast %cst_33 : f32 to vector<8x128xf32>
    %95 = arith.addf %94, %93 : vector<8x128xf32>
    %96 = arith.divf %94, %95 : vector<8x128xf32>
    %97 = vector.extract_strided_slice %96 {offsets = [0, 0], sizes = [8, 32], strides = [1, 1]} : vector<8x128xf32> to vector<8x32xf32>
    %98 = vector.extract_strided_slice %96 {offsets = [0, 32], sizes = [8, 32], strides = [1, 1]} : vector<8x128xf32> to vector<8x32xf32>
    %99 = vector.extract_strided_slice %96 {offsets = [0, 96], sizes = [8, 32], strides = [1, 1]} : vector<8x128xf32> to vector<8x32xf32>
    %100 = vector.extract_strided_slice %91 {offsets = [0, 64], sizes = [8, 32], strides = [1, 1]} : vector<8x128xf32> to vector<8x32xf32>
    %101 = math.tanh %100 : vector<8x32xf32>
    %102 = arith.mulf %98, %85 : vector<8x32xf32>
    %103 = arith.mulf %97, %101 : vector<8x32xf32>
    %104 = arith.addf %102, %103 : vector<8x32xf32>
    %105 = math.tanh %104 : vector<8x32xf32>
    %106 = arith.mulf %99, %105 : vector<8x32xf32>
    %c5 = arith.constant 5 : index
    %c0_34 = arith.constant 0 : index
    %c0_35 = arith.constant 0 : index
    %107 = vector.load %arg8[%c5, %c0_34, %c0_35] : memref<8x8x128xf32, #tpu.memory_space<vmem>>, vector<1x8x128xf32>
    %108 = vector.shape_cast %107 : vector<1x8x128xf32> to vector<8x128xf32>
    %cst_36 = arith.constant dense<0.000000e+00> : vector<8x128xf32>
    %109 = tpu.matmul %106, %9, %cst_36 {dimension_numbers = #tpu.dot_dimension_numbers<[1], [0], [0], [1], [0, 0, 1, 1], [], []>} : vector<8x32xf32>, vector<32x128xf32>, vector<8x128xf32> -> vector<8x128xf32>
    %110 = arith.addf %108, %109 : vector<8x128xf32>
    %111 = arith.negf %110 : vector<8x128xf32>
    %112 = math.exp %111 : vector<8x128xf32>
    %cst_37 = arith.constant 1.000000e+00 : f32
    %113 = vector.broadcast %cst_37 : f32 to vector<8x128xf32>
    %114 = arith.addf %113, %112 : vector<8x128xf32>
    %115 = arith.divf %113, %114 : vector<8x128xf32>
    %116 = vector.extract_strided_slice %115 {offsets = [0, 0], sizes = [8, 32], strides = [1, 1]} : vector<8x128xf32> to vector<8x32xf32>
    %117 = vector.extract_strided_slice %115 {offsets = [0, 32], sizes = [8, 32], strides = [1, 1]} : vector<8x128xf32> to vector<8x32xf32>
    %118 = vector.extract_strided_slice %115 {offsets = [0, 96], sizes = [8, 32], strides = [1, 1]} : vector<8x128xf32> to vector<8x32xf32>
    %119 = vector.extract_strided_slice %110 {offsets = [0, 64], sizes = [8, 32], strides = [1, 1]} : vector<8x128xf32> to vector<8x32xf32>
    %120 = math.tanh %119 : vector<8x32xf32>
    %121 = arith.mulf %117, %104 : vector<8x32xf32>
    %122 = arith.mulf %116, %120 : vector<8x32xf32>
    %123 = arith.addf %121, %122 : vector<8x32xf32>
    %124 = math.tanh %123 : vector<8x32xf32>
    %125 = arith.mulf %118, %124 : vector<8x32xf32>
    %c6 = arith.constant 6 : index
    %c0_38 = arith.constant 0 : index
    %c0_39 = arith.constant 0 : index
    %126 = vector.load %arg8[%c6, %c0_38, %c0_39] : memref<8x8x128xf32, #tpu.memory_space<vmem>>, vector<1x8x128xf32>
    %127 = vector.shape_cast %126 : vector<1x8x128xf32> to vector<8x128xf32>
    %cst_40 = arith.constant dense<0.000000e+00> : vector<8x128xf32>
    %128 = tpu.matmul %125, %9, %cst_40 {dimension_numbers = #tpu.dot_dimension_numbers<[1], [0], [0], [1], [0, 0, 1, 1], [], []>} : vector<8x32xf32>, vector<32x128xf32>, vector<8x128xf32> -> vector<8x128xf32>
    %129 = arith.addf %127, %128 : vector<8x128xf32>
    %130 = arith.negf %129 : vector<8x128xf32>
    %131 = math.exp %130 : vector<8x128xf32>
    %cst_41 = arith.constant 1.000000e+00 : f32
    %132 = vector.broadcast %cst_41 : f32 to vector<8x128xf32>
    %133 = arith.addf %132, %131 : vector<8x128xf32>
    %134 = arith.divf %132, %133 : vector<8x128xf32>
    %135 = vector.extract_strided_slice %134 {offsets = [0, 0], sizes = [8, 32], strides = [1, 1]} : vector<8x128xf32> to vector<8x32xf32>
    %136 = vector.extract_strided_slice %134 {offsets = [0, 32], sizes = [8, 32], strides = [1, 1]} : vector<8x128xf32> to vector<8x32xf32>
    %137 = vector.extract_strided_slice %134 {offsets = [0, 96], sizes = [8, 32], strides = [1, 1]} : vector<8x128xf32> to vector<8x32xf32>
    %138 = vector.extract_strided_slice %129 {offsets = [0, 64], sizes = [8, 32], strides = [1, 1]} : vector<8x128xf32> to vector<8x32xf32>
    %139 = math.tanh %138 : vector<8x32xf32>
    %140 = arith.mulf %136, %123 : vector<8x32xf32>
    %141 = arith.mulf %135, %139 : vector<8x32xf32>
    %142 = arith.addf %140, %141 : vector<8x32xf32>
    %143 = math.tanh %142 : vector<8x32xf32>
    %144 = arith.mulf %137, %143 : vector<8x32xf32>
    %c7 = arith.constant 7 : index
    %c0_42 = arith.constant 0 : index
    %c0_43 = arith.constant 0 : index
    %145 = vector.load %arg8[%c7, %c0_42, %c0_43] : memref<8x8x128xf32, #tpu.memory_space<vmem>>, vector<1x8x128xf32>
    %146 = vector.shape_cast %145 : vector<1x8x128xf32> to vector<8x128xf32>
    %cst_44 = arith.constant dense<0.000000e+00> : vector<8x128xf32>
    %147 = tpu.matmul %144, %9, %cst_44 {dimension_numbers = #tpu.dot_dimension_numbers<[1], [0], [0], [1], [0, 0, 1, 1], [], []>} : vector<8x32xf32>, vector<32x128xf32>, vector<8x128xf32> -> vector<8x128xf32>
    %148 = arith.addf %146, %147 : vector<8x128xf32>
    %149 = arith.negf %148 : vector<8x128xf32>
    %150 = math.exp %149 : vector<8x128xf32>
    %cst_45 = arith.constant 1.000000e+00 : f32
    %151 = vector.broadcast %cst_45 : f32 to vector<8x128xf32>
    %152 = arith.addf %151, %150 : vector<8x128xf32>
    %153 = arith.divf %151, %152 : vector<8x128xf32>
    %154 = vector.extract_strided_slice %153 {offsets = [0, 0], sizes = [8, 32], strides = [1, 1]} : vector<8x128xf32> to vector<8x32xf32>
    %155 = vector.extract_strided_slice %153 {offsets = [0, 32], sizes = [8, 32], strides = [1, 1]} : vector<8x128xf32> to vector<8x32xf32>
    %156 = vector.extract_strided_slice %153 {offsets = [0, 96], sizes = [8, 32], strides = [1, 1]} : vector<8x128xf32> to vector<8x32xf32>
    %157 = vector.extract_strided_slice %148 {offsets = [0, 64], sizes = [8, 32], strides = [1, 1]} : vector<8x128xf32> to vector<8x32xf32>
    %158 = math.tanh %157 : vector<8x32xf32>
    %159 = arith.mulf %155, %142 : vector<8x32xf32>
    %160 = arith.mulf %154, %158 : vector<8x32xf32>
    %161 = arith.addf %159, %160 : vector<8x32xf32>
    %162 = math.tanh %161 : vector<8x32xf32>
    %163 = arith.mulf %156, %162 : vector<8x32xf32>
    %c0_46 = arith.constant 0 : index
    %c0_47 = arith.constant 0 : index
    %164 = vector.load %arg5[%c0_46, %c0_47] : memref<1x32xf32, #tpu.memory_space<vmem>>, vector<1x32xf32>
    %165 = vector.broadcast %164 : vector<1x32xf32> to vector<8x32xf32>
    %166 = arith.mulf %163, %165 : vector<8x32xf32>
    %cst_48 = arith.constant dense<0.000000e+00> : vector<8xf32>
    %167 = vector.multi_reduction <add>, %166, %cst_48 [1] : vector<8x32xf32> to vector<8xf32>
    %168 = vector.shape_cast %167 : vector<8xf32> to vector<8x1xf32>
    %c0_49 = arith.constant 0 : index
    %c0_50 = arith.constant 0 : index
    %169 = memref.load %arg6[%c0_49, %c0_50] : memref<1x1xf32, #tpu.memory_space<smem>>
    %170 = vector.broadcast %169 : f32 to vector<8x1xf32>
    %171 = arith.addf %168, %170 : vector<8x1xf32>
    %c0_51 = arith.constant 0 : index
    %c0_52 = arith.constant 0 : index
    %172 = vector.load %arg7[%c0_51, %c0_52] : memref<8x1xf32, #tpu.memory_space<vmem>>, vector<8x1xf32>
    tpu.vector_store %arg7[%c0_51, %c0_52], %171 {strides = array<i32>} : memref<8x1xf32, #tpu.memory_space<vmem>>, vector<8x1xf32>,
    return
  }
  func.func @transform_0(%arg0: i32) -> (i32, i32, i32) {
    %c0_i32 = arith.constant 0 : i32
    %c0_i32_0 = arith.constant 0 : i32
    %c0_i32_1 = arith.constant 0 : i32
    return %c0_i32, %arg0, %c0_i32_0 : i32, i32, i32
  }
  func.func @transform_1(%arg0: i32) -> (i32, i32) {
    %c0_i32 = arith.constant 0 : i32
    %c0_i32_0 = arith.constant 0 : i32
    %c0_i32_1 = arith.constant 0 : i32
    return %c0_i32, %c0_i32_0 : i32, i32
  }
  func.func @transform_2(%arg0: i32) -> (i32, i32) {
    %c0_i32 = arith.constant 0 : i32
    %c0_i32_0 = arith.constant 0 : i32
    %c0_i32_1 = arith.constant 0 : i32
    return %c0_i32, %c0_i32_0 : i32, i32
  }
  func.func @transform_3(%arg0: i32) -> (i32, i32) {
    %c0_i32 = arith.constant 0 : i32
    %c0_i32_0 = arith.constant 0 : i32
    %c0_i32_1 = arith.constant 0 : i32
    return %c0_i32, %c0_i32_0 : i32, i32
  }
  func.func @transform_4(%arg0: i32) -> (i32, i32) {
    %c0_i32 = arith.constant 0 : i32
    %c0_i32_0 = arith.constant 0 : i32
    %c0_i32_1 = arith.constant 0 : i32
    return %c0_i32, %c0_i32_0 : i32, i32
  }
  func.func @transform_5(%arg0: i32) -> (i32, i32) {
    %c0_i32 = arith.constant 0 : i32
    %c0_i32_0 = arith.constant 0 : i32
    %c0_i32_1 = arith.constant 0 : i32
    return %c0_i32, %c0_i32_0 : i32, i32
  }
  func.func @transform_6(%arg0: i32) -> (i32, i32) {
    %c0_i32 = arith.constant 0 : i32
    %c0_i32_0 = arith.constant 0 : i32
    return %arg0, %c0_i32 : i32, i32
  }
}

</mosaic_0001>

<bundles_post_ra>
// kernel: tpu_custom_call.1
= control target key start
LH: loop header
LB: loop body
LE: loop exit
PB: predicated region body
PF: predicated region fallthrough
CT: control target
= control target key end

     0   :  { %vm65_vm0 = vcmask 1043456   ;;  %vm40_vm1 = vcmask 31744   ;;  %v1321_v0 = vmov 0.0|0.0   ;;  %vm1322_vm2 = vmmov 0   ;;  %s1324_s11 = smov 64   ;;  %s1326_s25 = smov 96   ;;  %s1538_s2 = inlined_call_operand.vmem [shape: f32[32,128], index: 2, kind: input, shape index: {}]   ;;  %s1539_s1 = inlined_call_operand.vmem [shape: f32[4,128], index: 1, kind: input, shape index: {}]   ;;  %s1540_s0 = inlined_call_operand.vmem [shape: f32[8,8,4], index: 0, kind: input, shape index: {}]   ;;  %s1541_s3 = inlined_call_operand.vmem [shape: f32[1,128], index: 3, kind: input, shape index: {}]   ;;  %s1542_s4 = inlined_call_operand.vmem [shape: f32[1,32], index: 4, kind: input, shape index: {}]   ;;  %s1543_s5 = inlined_call_operand.<no memory space> [shape: f32[1,1], index: 5, kind: input, shape index: {}]   ;;  %s1544_s6 = inlined_call_operand.vmem [shape: f32[8,1], index: 6, kind: output, shape index: {}]  }
   0x1   :  { %1203 = vmatprep.subr.bf16.mxu1 %v1321_v0  ;;  %v182_v1 = vld [vmem:[%s1538_s2] sm:$0xff]  ;;  %v183_v2 = vld [vmem:[%s1538_s2 + $0x8] sm:$0xff]  ;;  %v184_v7 = vld [vmem:[%s1538_s2 + $0x10] sm:$0xff]  ;;  %v1323_v8 = vmov 0.0   ;;  %vm187_vm3 = vcmask 261120   ;;  %vm1020_vm4 = vcmask 7168  }
   0x2   :  { %v32_v3 = vld [vmem:[%s1539_s1] sm:$0xf]  ;;  %v1372_v4 = vpack.c.bf16 %v183_v2, %v182_v1  ;;  %v25_v6 = vld [vmem:[%s1540_s0 + $0x8] sm:$0xff]  ;;  %1123 = vmatprep.mubr.msk.f32.mxu1 %vm1322_vm2, %v1323_v8  ;;  %v185_v9 = vld [vmem:[%s1538_s2 + $0x18] sm:$0xff] }
   0x3   :  { %1101 = vmatprep.subr.msk.mxu0 %vm65_vm0, %v32_v3  ;;  %v24_v5 = vld [vmem:[%s1540_s0] sm:$0xff]  ;;  %v1393_v10 = vpack.c.bf16 %v185_v9, %v184_v7  ;;  %v26_v46 = vld [vmem:[%s1540_s0 + $0x10] sm:$0xff]  ;;  %v27_v47 = vld [vmem:[%s1540_s0 + $0x18] sm:$0xff] }
   0x4   :  { %1102 = vmatpush3.msk.msra.mxu0 %vm65_vm0, %v32_v3  ;;  %1103 = vmatprep.mubr.msk.f32.mxu0 %vm40_vm1, %v24_v5  ;;  %v1413_v12 = vld [vmem:[%s1541_s3] ss:$0 sm:$0xff]  ;;  %s1325_s3 = smov 32   ;;  %v29_v49 = vld [vmem:[%s1540_s0 + $0x28] sm:$0xff]  ;;  %v30_v50 = vld [vmem:[%s1540_s0 + $0x30] sm:$0xff] }
   0x5   :  { %1205 = vmatpush3.bf16.msra.mxu1 %v1372_v4  ;;  %1104 = vmatmul.mubr.msk.f32.vlgmr.msra.gmra.mrb[0].mxu0 %vm40_vm1, %v25_v6  ;;  %v28_v48 = vld [vmem:[%s1540_s0 + $0x20] sm:$0xff]  ;;  %v31_v51 = vld [vmem:[%s1540_s0 + $0x38] sm:$0xff] }
   0x6   :  { %1206 = vmatprep.subr.bf16.mxu1 %v1321_v0  ;;  %1215 = vmatprep.subr.bf16.mxu0 %v1321_v0 }
   0x7   :  { %1217 = vmatpush3.bf16.msra.mxu0 %v1372_v4  ;;  %1106 = vmatprep.mubr.msk.f32.mxu0 %vm40_vm1, %v26_v46 }
   0x8   :  { %1218 = vmatprep.subr.bf16.mxu0 %v1321_v0 }
   0x9   :  { %1208 = vmatpush3.bf16.msra.mxu1 %v1393_v10  ;;  %1107 = vmatmul.mubr.msk.f32.gmra.mrb[2].mxu0 %vm40_vm1, %v27_v47 }
   0xa   :  { %1209 = vmatprep.subr.bf16.mxu1 %v1321_v0  ;;  %1109 = vmatprep.mubr.msk.f32.mxu0 %vm40_vm1, %v28_v48 }
   0xb   :  { %1220 = vmatpush3.bf16.msra.mxu0 %v1393_v10 }
   0xc   :  { %1124 = vmatmul.mubr.f32.vlgmr.msra.gmra.mrb[0].mxu1 %v1323_v8  ;;  %1227 = vmatprep.subr.bf16.mxu0 %v1321_v0 }
   0xd   :  { %1211 = vmatpush3.bf16.msra.mxu1 %v1372_v4  ;;  %1134 = vmatprep.mubr.msk.f32.mxu1 %vm1322_vm2, %v1323_v8 }
   0xe   :  { %1212 = vmatprep.subr.bf16.mxu1 %v1321_v0  ;;  %1110 = vmatmul.mubr.msk.f32.gmra.mrb[4].mxu0 %vm40_vm1, %v29_v49 }
   0xf   :  { %1112 = vmatprep.mubr.msk.f32.mxu0 %vm40_vm1, %v30_v50 }
  0x11   :  { %1214 = vmatpush3.bf16.msra.mxu1 %v1393_v10 }
  0x12   :  { %1221 = vmatprep.subr.bf16.mxu1 %v1321_v0  ;;  %1113 = vmatmul.mubr.msk.f32.gmra.mrb[6].mxu0 %vm40_vm1, %v31_v51 }
  0x13   :  { %1145 = vmatprep.mubr.msk.f32.mxu0 %vm1322_vm2, %v1323_v8 }
  0xd8   :  { %v1105_v11 = vpop.f32.mrb[0].mxu0 }
  0xd9   :  { %v135_v13 = vpop.f32.mrb[1].mxu0  ;;  %v141_v32 = vadd.f32 %v1105_v11, %v1413_v12 }
  0xda   :  { %v136_v14 = vadd.f32 %v1413_v12, %v135_v13 }
  0xdc   :  { %v1108_v55 = vpop.f32.mrb[2].mxu0 }
  0xdd   :  { %v145_v56 = vpop.f32.mrb[3].mxu0 }
  0xde   :  { %v146_v62 = vadd.f32 %v1413_v12, %v145_v56 }
  0xdf   :  { %v257_v15 = vpop.f32.mrb[0].mxu1 }
  0xe0   :  { %v261_v16 = vadd.f32 %v257_v15, %v136_v14  ;;  %v1125_v17 = vpop.f32.mrb[1].mxu1 }
  0xe1   :  { %v1458_v57 = vpop.f32.mrb[4].mxu0 }
  0xe2   :  { %1257 = vtanh.f32 %v261_v16  ;;  %v1036_v19 = vmul.f32 -1.442695, %v261_v16  ;;  %v1460_v58 = vpop.f32.mrb[5].mxu0 }
  0xe4   :  { %1259 = vpow2.f32 %v1036_v19 }
  0xe5   :  { %v1462_v59 = vpop.f32.mrb[6].mxu0 }
  0xe6   :  { %v1464_v60 = vpop.f32.mrb[7].mxu0 }
  0xec   :  { %v1258_v18 = vpop.eup %1257 }
  0xed   :  { %271 = vrot.lane.b32.xlu0 %v1258_v18, %s1324_s11 }
  0xee   :  { %v1260_v20 = vpop.eup %1259 }
  0xef   :  { %v265_v21 = vadd.f32 1.0, %v1260_v20 }
  0xf1   :  { %1261 = vrcp.f32 %v265_v21  ;;  %v151_v21 = vadd.f32 %v1108_v55, %v1413_v12 }
  0xfb   :  { %v1262_v22 = vpop.eup %1261 }
  0xfc   :  { %v269_v25 = vmul.f32 0.0, %v1262_v22 }
 0x15f   :  { %v272_v23 = vpop.permute.xlu0 %271 }
 0x160   :  { %v274_v24 = vmul.f32 %v1262_v22, %v272_v23 }
 0x162   :  { %276 = vrot.lane.b32.xlu0 %v274_v24, %s1325_s3 }
 0x1d4   :  { %v277_v26 = vpop.permute.xlu0 %276 }
 0x1d5   :  { %v279_v27 = vadd.f32 %v277_v26, %v269_v25 }
 0x1d7   :  { %1263 = vtanh.f32 %v279_v27 }
 0x1e1   :  { %v1264_v28 = vpop.eup %1263 }
 0x1e2   :  { %282 = vrot.lane.b32.xlu1 %v1264_v28, %s1324_s11 }
 0x254   :  { %v283_v29 = vpop.permute.xlu1 %282 }
 0x255   :  { %v285_v30 = vmul.f32 %v1262_v22, %v283_v29 }
 0x257   :  { %289 = vrot.lane.b32.xlu1 %v285_v30, %s1325_s3 }
 0x2c9   :  { %v290_v31 = vpop.permute.xlu1 %289 }
 0x2ca   :  { %1135 = vmatmul.mubr.msk.f32.vlgmr.msra.gmra.mrb[2].mxu1 %vm187_vm3, %v290_v31 }
 0x2cb   :  { %1223 = vmatpush3.bf16.msra.mxu1 %v1372_v4  ;;  %1156 = vmatprep.mubr.msk.f32.mxu1 %vm1322_vm2, %v1323_v8 }
 0x2cc   :  { %1224 = vmatprep.subr.bf16.mxu1 %v1321_v0 }
 0x2cf   :  { %1226 = vmatpush3.bf16.msra.mxu1 %v1393_v10 }
 0x2d0   :  { %1233 = vmatprep.subr.bf16.mxu1 %v1321_v0 }
 0x39d   :  { %v359_v33 = vpop.f32.mrb[2].mxu1 }
 0x39e   :  { %v363_v34 = vadd.f32 %v359_v33, %v141_v32  ;;  %v1136_v35 = vpop.f32.mrb[3].mxu1 }
 0x3a0   :  { %1265 = vtanh.f32 %v363_v34  ;;  %v1038_v37 = vmul.f32 -1.442695, %v363_v34 }
 0x3a2   :  { %1267 = vpow2.f32 %v1038_v37 }
 0x3aa   :  { %v1266_v36 = vpop.eup %1265 }
 0x3ab   :  { %373 = vrot.lane.b32.xlu0 %v1266_v36, %s1324_s11 }
 0x3ac   :  { %v1268_v38 = vpop.eup %1267 }
 0x3ad   :  { %v367_v39 = vadd.f32 1.0, %v1268_v38 }
 0x3af   :  { %1269 = vrcp.f32 %v367_v39  ;;  %v156_v39 = vadd.f32 %v1413_v12, %v1460_v58  ;;  %v161_v58 = vadd.f32 %v1458_v57, %v1413_v12 }
 0x3b9   :  { %v1270_v40 = vpop.eup %1269 }
 0x3ba   :  { %v371_v43 = vmul.f32 %v1270_v40, %v279_v27 }
 0x41d   :  { %v374_v41 = vpop.permute.xlu0 %373 }
 0x41e   :  { %v376_v42 = vmul.f32 %v1270_v40, %v374_v41 }
 0x420   :  { %378 = vrot.lane.b32.xlu1 %v376_v42, %s1325_s3 }
 0x492   :  { %v379_v44 = vpop.permute.xlu1 %378 }
 0x493   :  { %v381_v45 = vadd.f32 %v379_v44, %v371_v43 }
 0x495   :  { %1271 = vtanh.f32 %v381_v45 }
 0x49f   :  { %v1272_v52 = vpop.eup %1271 }
 0x4a0   :  { %384 = vrot.lane.b32.xlu0 %v1272_v52, %s1324_s11 }
 0x512   :  { %v385_v53 = vpop.permute.xlu0 %384 }
 0x513   :  { %v387_v54 = vmul.f32 %v1270_v40, %v385_v53 }
 0x515   :  { %391 = vrot.lane.b32.xlu1 %v387_v54, %s1325_s3 }
 0x587   :  { %v392_v61 = vpop.permute.xlu1 %391 }
 0x588   :  { %1146 = vmatmul.mubr.msk.f32.vlgmr.msra.gmra.mrb[8].mxu0 %vm187_vm3, %v392_v61 }
 0x589   :  { %1229 = vmatpush3.bf16.msra.mxu0 %v1372_v4  ;;  %1167 = vmatprep.mubr.msk.f32.mxu0 %vm1322_vm2, %v1323_v8 }
 0x58a   :  { %1230 = vmatprep.subr.bf16.mxu0 %v1321_v0 }
 0x58d   :  { %1232 = vmatpush3.bf16.msra.mxu0 %v1393_v10 }
 0x58e   :  { %1239 = vmatprep.subr.bf16.mxu0 %v1321_v0 }
 0x65b   :  { %v461_v63 = vpop.f32.mrb[8].mxu0 }
 0x65c   :  { %v465_v1 = vadd.f32 %v461_v63, %v146_v62  ;;  %v1147_v2 = vpop.f32.mrb[9].mxu0 }
 0x65e   :  { %1273 = vtanh.f32 %v465_v1  ;;  %v1040_v5 = vmul.f32 -1.442695, %v465_v1 }
 0x660   :  { %1275 = vpow2.f32 %v1040_v5 }
 0x668   :  { %v1274_v3 = vpop.eup %1273 }
 0x669   :  { %475 = vrot.lane.b32.xlu0 %v1274_v3, %s1324_s11 }
 0x66a   :  { %v1276_v6 = vpop.eup %1275 }
 0x66b   :  { %v469_v7 = vadd.f32 1.0, %v1276_v6 }
 0x66d   :  { %1277 = vrcp.f32 %v469_v7 }
 0x677   :  { %v1278_v9 = vpop.eup %1277 }
 0x678   :  { %v473_v14 = vmul.f32 %v1278_v9, %v381_v45 }
 0x6db   :  { %v476_v11 = vpop.permute.xlu0 %475 }
 0x6dc   :  { %v478_v13 = vmul.f32 %v1278_v9, %v476_v11 }
 0x6de   :  { %480 = vrot.lane.b32.xlu1 %v478_v13, %s1325_s3 }
 0x750   :  { %v481_v15 = vpop.permute.xlu1 %480 }
 0x751   :  { %v483_v16 = vadd.f32 %v481_v15, %v473_v14  ;;  %v166_v14 = vadd.f32 %v1413_v12, %v1464_v60 }
 0x753   :  { %1279 = vtanh.f32 %v483_v16 }
 0x75d   :  { %v1280_v17 = vpop.eup %1279 }
 0x75e   :  { %486 = vrot.lane.b32.xlu0 %v1280_v17, %s1324_s11 }
 0x7d0   :  { %v487_v18 = vpop.permute.xlu0 %486 }
 0x7d1   :  { %v489_v19 = vmul.f32 %v1278_v9, %v487_v18 }
 0x7d3   :  { %493 = vrot.lane.b32.xlu1 %v489_v19, %s1325_s3 }
 0x845   :  { %v494_v20 = vpop.permute.xlu1 %493 }
 0x846   :  { %1157 = vmatmul.mubr.msk.f32.vlgmr.msra.gmra.mrb[4].mxu1 %vm187_vm3, %v494_v20 }
 0x847   :  { %1235 = vmatpush3.bf16.msra.mxu1 %v1372_v4  ;;  %1178 = vmatprep.mubr.msk.f32.mxu1 %vm1322_vm2, %v1323_v8 }
 0x848   :  { %1236 = vmatprep.subr.bf16.mxu1 %v1321_v0 }
 0x84b   :  { %1238 = vmatpush3.bf16.msra.mxu1 %v1393_v10 }
 0x84c   :  { %1245 = vmatprep.subr.bf16.mxu1 %v1321_v0 }
 0x919   :  { %v563_v22 = vpop.f32.mrb[4].mxu1 }
 0x91a   :  { %v567_v23 = vadd.f32 %v563_v22, %v151_v21  ;;  %v1158_v24 = vpop.f32.mrb[5].mxu1 }
 0x91c   :  { %1281 = vtanh.f32 %v567_v23  ;;  %v1042_v26 = vmul.f32 -1.442695, %v567_v23 }
 0x91e   :  { %1283 = vpow2.f32 %v1042_v26 }
 0x926   :  { %v1282_v25 = vpop.eup %1281 }
 0x927   :  { %577 = vrot.lane.b32.xlu0 %v1282_v25, %s1324_s11 }
 0x928   :  { %v1284_v27 = vpop.eup %1283 }
 0x929   :  { %v571_v28 = vadd.f32 1.0, %v1284_v27 }
 0x92b   :  { %1285 = vrcp.f32 %v571_v28 }
 0x935   :  { %v1286_v29 = vpop.eup %1285 }
 0x936   :  { %v575_v32 = vmul.f32 %v1286_v29, %v483_v16 }
 0x999   :  { %v578_v30 = vpop.permute.xlu0 %577 }
 0x99a   :  { %v580_v31 = vmul.f32 %v1286_v29, %v578_v30 }
 0x99c   :  { %582 = vrot.lane.b32.xlu1 %v580_v31, %s1325_s3  ;;  %v171_v31 = vadd.f32 %v1462_v59, %v1413_v12  ;;  %v1051_v12 = vld [vmem:[%s1542_s4] ss:$0 sm:$0xff] }
 0xa0e   :  { %v583_v33 = vpop.permute.xlu1 %582 }
 0xa0f   :  { %v585_v34 = vadd.f32 %v583_v33, %v575_v32 }
 0xa11   :  { %1287 = vtanh.f32 %v585_v34 }
 0xa1b   :  { %v1288_v35 = vpop.eup %1287 }
 0xa1c   :  { %588 = vrot.lane.b32.xlu0 %v1288_v35, %s1324_s11 }
 0xa8e   :  { %v589_v36 = vpop.permute.xlu0 %588 }
 0xa8f   :  { %v591_v37 = vmul.f32 %v1286_v29, %v589_v36 }
 0xa91   :  { %595 = vrot.lane.b32.xlu1 %v591_v37, %s1325_s3 }
 0xb03   :  { %v596_v38 = vpop.permute.xlu1 %595 }
 0xb04   :  { %1168 = vmatmul.mubr.msk.f32.vlgmr.msra.gmra.mrb[10].mxu0 %vm187_vm3, %v596_v38 }
 0xb05   :  { %1241 = vmatpush3.bf16.msra.mxu0 %v1372_v4  ;;  %1189 = vmatprep.mubr.msk.f32.mxu0 %vm1322_vm2, %v1323_v8 }
 0xb06   :  { %1242 = vmatprep.subr.bf16.mxu0 %v1321_v0 }
 0xb09   :  { %1244 = vmatpush3.bf16.msra.mxu0 %v1393_v10 }
 0xbd7   :  { %v665_v40 = vpop.f32.mrb[10].mxu0 }
 0xbd8   :  { %v669_v41 = vadd.f32 %v665_v40, %v156_v39  ;;  %v1169_v42 = vpop.f32.mrb[11].mxu0 }
 0xbda   :  { %1289 = vtanh.f32 %v669_v41  ;;  %v1044_v44 = vmul.f32 -1.442695, %v669_v41 }
 0xbdc   :  { %1291 = vpow2.f32 %v1044_v44 }
 0xbe4   :  { %v1290_v43 = vpop.eup %1289 }
 0xbe5   :  { %679 = vrot.lane.b32.xlu0 %v1290_v43, %s1324_s11 }
 0xbe6   :  { %v1292_v45 = vpop.eup %1291 }
 0xbe7   :  { %v673_v46 = vadd.f32 1.0, %v1292_v45 }
 0xbe9   :  { %1293 = vrcp.f32 %v673_v46 }
 0xbf3   :  { %v1294_v47 = vpop.eup %1293 }
 0xbf4   :  { %v677_v50 = vmul.f32 %v1294_v47, %v585_v34 }
 0xc57   :  { %v680_v48 = vpop.permute.xlu0 %679 }
 0xc58   :  { %v682_v49 = vmul.f32 %v1294_v47, %v680_v48 }
 0xc5a   :  { %684 = vrot.lane.b32.xlu1 %v682_v49, %s1325_s3 }
 0xccc   :  { %v685_v51 = vpop.permute.xlu1 %684 }
 0xccd   :  { %v687_v52 = vadd.f32 %v685_v51, %v677_v50  ;;  %v1018_v51 = vstv %s1543_s5 }
 0xccf   :  { %1295 = vtanh.f32 %v687_v52 }
 0xcd9   :  { %v1296_v53 = vpop.eup %1295 }
 0xcda   :  { %690 = vrot.lane.b32.xlu0 %v1296_v53, %s1324_s11 }
 0xd4c   :  { %v691_v54 = vpop.permute.xlu0 %690 }
 0xd4d   :  { %v693_v55 = vmul.f32 %v1294_v47, %v691_v54 }
 0xd4f   :  { %697 = vrot.lane.b32.xlu1 %v693_v55, %s1325_s3 }
 0xdc1   :  { %v698_v56 = vpop.permute.xlu1 %697 }
 0xdc2   :  { %1179 = vmatmul.mubr.msk.f32.vlgmr.msra.gmra.mrb[6].mxu1 %vm187_vm3, %v698_v56 }
 0xdc3   :  { %1247 = vmatpush3.bf16.msra.mxu1 %v1372_v4  ;;  %1200 = vmatprep.mubr.msk.f32.mxu1 %vm1322_vm2, %v1323_v8 }
 0xdc4   :  { %1248 = vmatprep.subr.bf16.mxu1 %v1321_v0 }
 0xdc7   :  { %1250 = vmatpush3.bf16.msra.mxu1 %v1393_v10 }
 0xe95   :  { %v767_v61 = vpop.f32.mrb[6].mxu1 }
 0xe96   :  { %v771_v62 = vadd.f32 %v767_v61, %v161_v58  ;;  %v1180_v63 = vpop.f32.mrb[7].mxu1 }
 0xe98   :  { %1297 = vtanh.f32 %v771_v62  ;;  %v1046_v2 = vmul.f32 -1.442695, %v771_v62 }
 0xe9a   :  { %1299 = vpow2.f32 %v1046_v2 }
 0xea2   :  { %v1298_v1 = vpop.eup %1297 }
 0xea3   :  { %781 = vrot.lane.b32.xlu0 %v1298_v1, %s1324_s11 }
 0xea4   :  { %v1300_v4 = vpop.eup %1299 }
 0xea5   :  { %v775_v3 = vadd.f32 1.0, %v1300_v4 }
 0xea7   :  { %1301 = vrcp.f32 %v775_v3 }
 0xeb1   :  { %v1302_v8 = vpop.eup %1301 }
 0xeb2   :  { %v779_v10 = vmul.f32 %v1302_v8, %v687_v52 }
 0xf15   :  { %v782_v5 = vpop.permute.xlu0 %781 }
 0xf16   :  { %v784_v0 = vmul.f32 %v1302_v8, %v782_v5 }
 0xf18   :  { %786 = vrot.lane.b32.xlu1 %v784_v0, %s1325_s3 }
 0xf8a   :  { %v787_v6 = vpop.permute.xlu1 %786 }
 0xf8b   :  { %v789_v57 = vadd.f32 %v787_v6, %v779_v10 }
 0xf8d   :  { %1303 = vtanh.f32 %v789_v57 }
 0xf97   :  { %v1304_v7 = vpop.eup %1303 }
 0xf98   :  { %792 = vrot.lane.b32.xlu0 %v1304_v7, %s1324_s11 }
0x100a   :  { %v793_v9 = vpop.permute.xlu0 %792 }
0x100b   :  { %v795_v11 = vmul.f32 %v1302_v8, %v793_v9 }
0x100d   :  { %799 = vrot.lane.b32.xlu1 %v795_v11, %s1325_s3 }
0x107f   :  { %v800_v13 = vpop.permute.xlu1 %799 }
0x1080   :  { %1190 = vmatmul.mubr.msk.f32.vlgmr.msra.gmra.mrb[12].mxu0 %vm187_vm3, %v800_v13 }
0x1153   :  { %v869_v15 = vpop.f32.mrb[12].mxu0 }
0x1154   :  { %v873_v16 = vadd.f32 %v869_v15, %v166_v14  ;;  %v1191_v17 = vpop.f32.mrb[13].mxu0 }
0x1156   :  { %1305 = vtanh.f32 %v873_v16  ;;  %v1048_v19 = vmul.f32 -1.442695, %v873_v16 }
0x1158   :  { %1307 = vpow2.f32 %v1048_v19 }
0x1160   :  { %v1306_v18 = vpop.eup %1305 }
0x1161   :  { %883 = vrot.lane.b32.xlu0 %v1306_v18, %s1324_s11 }
0x1162   :  { %v1308_v20 = vpop.eup %1307 }
0x1163   :  { %v877_v21 = vadd.f32 1.0, %v1308_v20 }
0x1165   :  { %1309 = vrcp.f32 %v877_v21 }
0x116f   :  { %v1310_v22 = vpop.eup %1309 }
0x1170   :  { %v881_v25 = vmul.f32 %v1310_v22, %v789_v57 }
0x11d3   :  { %v884_v23 = vpop.permute.xlu0 %883 }
0x11d4   :  { %v886_v24 = vmul.f32 %v1310_v22, %v884_v23 }
0x11d6   :  { %888 = vrot.lane.b32.xlu1 %v886_v24, %s1325_s3 }
0x1248   :  { %v889_v26 = vpop.permute.xlu1 %888 }
0x1249   :  { %v891_v60 = vadd.f32 %v889_v26, %v881_v25 }
0x124b   :  { %1311 = vtanh.f32 %v891_v60 }
0x1255   :  { %v1312_v27 = vpop.eup %1311 }
0x1256   :  { %894 = vrot.lane.b32.xlu0 %v1312_v27, %s1324_s11 }
0x12c8   :  { %v895_v28 = vpop.permute.xlu0 %894 }
0x12c9   :  { %v897_v29 = vmul.f32 %v1310_v22, %v895_v28 }
0x12cb   :  { %901 = vrot.lane.b32.xlu1 %v897_v29, %s1325_s3 }
0x133d   :  { %v902_v30 = vpop.permute.xlu1 %901 }
0x133e   :  { %1201 = vmatmul.mubr.msk.f32.vlgmr.msra.gmra.mrb[8].mxu1 %vm187_vm3, %v902_v30 }
0x1411   :  { %v971_v32 = vpop.f32.mrb[8].mxu1 }
0x1412   :  { %v975_v33 = vadd.f32 %v971_v32, %v171_v31  ;;  %v1202_v34 = vpop.f32.mrb[9].mxu1 }
0x1414   :  { %1313 = vtanh.f32 %v975_v33  ;;  %v1050_v36 = vmul.f32 -1.442695, %v975_v33 }
0x1416   :  { %1315 = vpow2.f32 %v1050_v36 }
0x141e   :  { %v1314_v35 = vpop.eup %1313 }
0x141f   :  { %985 = vrot.lane.b32.xlu0 %v1314_v35, %s1324_s11 }
0x1420   :  { %v1316_v37 = vpop.eup %1315 }
0x1421   :  { %v979_v38 = vadd.f32 1.0, %v1316_v37 }
0x1423   :  { %1317 = vrcp.f32 %v979_v38 }
0x142d   :  { %v1318_v39 = vpop.eup %1317 }
0x142e   :  { %v983_v59 = vmul.f32 %v1318_v39, %v891_v60 }
0x1491   :  { %v986_v40 = vpop.permute.xlu0 %985 }
0x1492   :  { %v988_v41 = vmul.f32 %v1318_v39, %v986_v40 }
0x1494   :  { %990 = vrot.lane.b32.xlu1 %v988_v41, %s1325_s3 }
0x1498   :  { %1006 = vrot.lane.b32.xlu1 %v1051_v12, %s1326_s25 }
0x1506   :  { %v991_v42 = vpop.permute.xlu1 %990 }
0x1507   :  { %v993_v43 = vadd.f32 %v991_v42, %v983_v59 }
0x1509   :  { %1319 = vtanh.f32 %v993_v43 }
0x150a   :  { %v1007_v46 = vpop.permute.xlu1 %1006 }
0x1513   :  { %v1320_v44 = vpop.eup %1319 }
0x1514   :  { %996 = vrot.lane.b32.xlu0 %v1320_v44, %s1324_s11 }
0x1586   :  { %v997_v45 = vpop.permute.xlu0 %996 }
0x1587   :  { %v999_v47 = vmul.f32 %v1318_v39, %v997_v45 }
0x1589   :  { %v1009_v48 = vmul.f32 %v1007_v46, %v999_v47 }
0x158b   :  { %1011 = vrot.lane.b32.xlu0 %v1009_v48, %s1325_s3 }
0x15fd   :  { %v1012_v49 = vpop.permute.xlu0 %1011 }
0x15fe   :  { %v1014_v50 = vsel %vm187_vm3, %v1012_v49, 0.0 }
0x15ff   :  { %1015 = vadd.xlane.f32.xlu1 %v1014_v50 }
0x168c   :  { %v1016_v52 = vpop.xlane.xlu1 %1015 }
0x168d   :  { %v1019_v53 = vadd.f32 %v1018_v51, %v1016_v52 }
0x168f   :  { %1021 = vst.msk [vmem:[%s1544_s6] sm:$0xff] %vm1020_vm4, %v1019_v53 }

</bundles_post_ra>
